<compile_context>
chip_gen: v5e
topology: v5e:2x2
jax: 0.10.0
libtpu: 0.0.40
codegen_flags: <defaults>
</compile_context>

<pallas_src>
import jax
import jax.numpy as jnp
from jax.experimental import pallas as pl
from jax.experimental.pallas import tpu as pltpu

LANE = 128
SUBLANE = 8


def gcn_kernel(adj_ref, x_ref, w_ref, b_ref, pool_ref, out_ref):
    """Three GCNConv layers + global mean pool, fully resident in VMEM.

    adj_ref : [NP, NP] bf16   normalized adjacency A_hat (zero-padded)
    x_ref   : [NP, FP] bf16   node features (zero-padded)
    w_ref   : [3, FP, FP] bf16  packed conv weights (W1|W2|W3, zero-padded)
    b_ref   : [3, FP] f32       packed conv biases
    pool_ref: [GP, NP] bf16     mean-pool matrix (zero-padded)
    out_ref : [GP, FP] f32      pooled graph embeddings (lane-dense output)
    """
    adj = adj_ref[...]                                   # bf16 [NP, NP]

    # ---- GCNConv 1 + ReLU:  relu(A_hat @ (X @ W1) + b1) ----
    h = jnp.dot(x_ref[...], w_ref[0], preferred_element_type=jnp.float32)
    h = jnp.dot(adj, h.astype(jnp.bfloat16), preferred_element_type=jnp.float32)
    h = jnp.maximum(h + b_ref[0:1, :], 0.0)              # f32 bias + ReLU on VPU

    # ---- GCNConv 2 + ReLU ----
    h = jnp.dot(h.astype(jnp.bfloat16), w_ref[1], preferred_element_type=jnp.float32)
    h = jnp.dot(adj, h.astype(jnp.bfloat16), preferred_element_type=jnp.float32)
    h = jnp.maximum(h + b_ref[1:2, :], 0.0)

    # ---- GCNConv 3 (no ReLU, matches reference) ----
    h = jnp.dot(h.astype(jnp.bfloat16), w_ref[2], preferred_element_type=jnp.float32)
    h = jnp.dot(adj, h.astype(jnp.bfloat16), preferred_element_type=jnp.float32)
    h = h + b_ref[2:3, :]

    # ---- global_mean_pool: [GP, NP] @ [NP, FP] -> lane-dense [GP, FP] f32 ----
    out_ref[...] = jnp.dot(pool_ref[...], h.astype(jnp.bfloat16),
                           preferred_element_type=jnp.float32)


def _round_up(n, m):
    return ((n + m - 1) // m) * m


def _pad_to(a, shape):
    pads = [(0, t - s) for s, t in zip(a.shape, shape)]
    return jnp.pad(a, pads)


def gcn_forward(adj, x, params, pool):
    """adj: [N, N] f32, x: [N, in_dim] f32, pool: [G, N] f32."""
    w1, b1, w2, b2, w3, b3, wl, bl = params
    n = adj.shape[0]
    in_dim = x.shape[1]
    dim_h = w1.shape[1]
    g = pool.shape[0]

    npad = _round_up(n, LANE)                       # node dim feeds adj lanes / h rows
    fpad = _round_up(max(in_dim, dim_h), LANE)      # common 128-multiple feature dim
    gpad = _round_up(g, SUBLANE)

    # Zero-pad + cast the MXU operands to bf16 (f32 accumulation happens in-kernel).
    adj_p = _pad_to(adj, (npad, npad)).astype(jnp.bfloat16)
    x_p = _pad_to(x, (npad, fpad)).astype(jnp.bfloat16)
    pool_p = _pad_to(pool, (gpad, npad)).astype(jnp.bfloat16)

    # Pack conv weights / biases into single slabs (fewer tiny DMA descriptors).
    w_slab = jnp.stack([_pad_to(w1, (fpad, fpad)),
                        _pad_to(w2, (fpad, fpad)),
                        _pad_to(w3, (fpad, fpad))]).astype(jnp.bfloat16)
    b_slab = jnp.stack([_pad_to(b1.reshape(-1), (fpad,)),
                        _pad_to(b2.reshape(-1), (fpad,)),
                        _pad_to(b3.reshape(-1), (fpad,))]).astype(jnp.float32)

    vmem = pl.BlockSpec(memory_space=pltpu.MemorySpace.VMEM)
    pooled = pl.pallas_call(
        gcn_kernel,
        out_shape=jax.ShapeDtypeStruct((gpad, fpad), jnp.float32),
        in_specs=[vmem] * 5,
        out_specs=vmem,
        compiler_params=pltpu.CompilerParams(vmem_limit_bytes=32 * 1024 * 1024),
    )(adj_p, x_p, w_slab, b_slab, pool_p)

    # Dropout (p=0.5) is identity in eval mode; the final Linear(dim_h, 1) is a tiny
    # [G, dim_h] @ [dim_h, 1] done in XLA so the kernel output stays lane-dense.
    return jnp.dot(pooled[:g, :dim_h], wl) + bl


def build_normalized_adj(edge_index, num_nodes):
    """A_hat = D^-1/2 (A + I) D^-1/2, dense [N, N] float32."""
    src, dst = edge_index[0], edge_index[1]
    a = jnp.zeros((num_nodes, num_nodes), jnp.float32)
    # message passing src -> dst: out[dst] += norm * x[src]  =>  A[dst, src] = 1
    a = a.at[dst, src].set(1.0)
    a = a + jnp.eye(num_nodes, dtype=jnp.float32)      # self loops
    deg = a.sum(axis=1)
    dinv = jnp.where(deg > 0, 1.0 / jnp.sqrt(deg), 0.0)
    return dinv[:, None] * a * dinv[None, :]


def build_mean_pool(batch, num_graphs):
    """pool[g, n] = 1/|{n : batch[n]==g}| if batch[n]==g else 0."""
    onehot = (batch[None, :] == jnp.arange(num_graphs)[:, None]).astype(jnp.float32)
    counts = jnp.maximum(onehot.sum(axis=1, keepdims=True), 1.0)
    return onehot / counts


def init_params(key, dim_h, in_dim=11):
    ks = jax.random.split(key, 4)

    def glorot(k, fan_in, fan_out):
        lim = jnp.sqrt(6.0 / (fan_in + fan_out))
        return jax.random.uniform(k, (fan_in, fan_out), jnp.float32, -lim, lim)

    w1 = glorot(ks[0], in_dim, dim_h)
    w2 = glorot(ks[1], dim_h, dim_h)
    w3 = glorot(ks[2], dim_h, dim_h)
    b1 = jnp.zeros((1, dim_h), jnp.float32)
    b2 = jnp.zeros((1, dim_h), jnp.float32)
    b3 = jnp.zeros((1, dim_h), jnp.float32)
    wl = glorot(ks[3], dim_h, 1)
    bl = jnp.zeros((1, 1), jnp.float32)
    return (w1, b1, w2, b2, w3, b3, wl, bl)


if __name__ == "__main__":
    key = jax.random.PRNGKey(0)
    k_feat, k_param = jax.random.split(key)

    N = 16          # total nodes (two graphs of 8 nodes each)
    IN_DIM = 11     # GCNConv(11, dim_h)
    DIM_H = 32
    NUM_GRAPHS = 2

    # Deterministic node features (data.x)
    x = jax.random.normal(k_feat, (N, IN_DIM), jnp.float32)

    # Deterministic edge_index (data.edge_index): ring within each 8-node graph,
    # both directions (undirected).
    edges = []
    for g in range(NUM_GRAPHS):
        base = g * 8
        for i in range(8):
            u, v = base + i, base + (i + 1) % 8
            edges.append((u, v))
            edges.append((v, u))
    edge_index = jnp.array(edges, dtype=jnp.int32).T  # [2, E]

    # data.batch: nodes 0..7 -> graph 0, 8..15 -> graph 1
    batch = jnp.array([0] * 8 + [1] * 8, dtype=jnp.int32)

    adj = build_normalized_adj(edge_index, N)          # [N, N]
    pool = build_mean_pool(batch, NUM_GRAPHS)          # [G, N]
    params = init_params(k_param, DIM_H, IN_DIM)

    out = gcn_forward(adj, x, params, pool)            # [G, 1]
    jax.block_until_ready(out)
    assert out.shape == (NUM_GRAPHS, 1)
    assert bool(jnp.all(jnp.isfinite(out)))
    print("KERNEL_OK")
</pallas_src>

<mosaic_0001>
module attributes {stable_mosaic.version = 11 : i64} {
  func.func @gcn_kernel(%arg0: memref<128x128xbf16, #tpu.memory_space<vmem>>, %arg1: memref<128x128xbf16, #tpu.memory_space<vmem>>, %arg2: memref<3x128x128xbf16, #tpu.memory_space<vmem>>, %arg3: memref<3x128xf32, #tpu.memory_space<vmem>>, %arg4: memref<8x128xbf16, #tpu.memory_space<vmem>>, %arg5: memref<8x128xf32, #tpu.memory_space<vmem>>) attributes {dimension_semantics = [], scalar_prefetch = 0 : i64, scratch_operands = 0 : i64, tpu.core_type = #tpu.core_type<tc>} {
    %c0 = arith.constant 0 : index
    %c0_0 = arith.constant 0 : index
    %0 = vector.load %arg0[%c0, %c0_0] : memref<128x128xbf16, #tpu.memory_space<vmem>>, vector<128x128xbf16>
    %c0_1 = arith.constant 0 : index
    %c0_2 = arith.constant 0 : index
    %1 = vector.load %arg1[%c0_1, %c0_2] : memref<128x128xbf16, #tpu.memory_space<vmem>>, vector<128x128xbf16>
    %c0_3 = arith.constant 0 : index
    %c0_4 = arith.constant 0 : index
    %c0_5 = arith.constant 0 : index
    %2 = vector.load %arg2[%c0_3, %c0_4, %c0_5] : memref<3x128x128xbf16, #tpu.memory_space<vmem>>, vector<1x128x128xbf16>
    %3 = vector.shape_cast %2 : vector<1x128x128xbf16> to vector<128x128xbf16>
    %cst = arith.constant dense<0.000000e+00> : vector<128x128xf32>
    %4 = tpu.matmul %1, %3, %cst {dimension_numbers = #tpu.dot_dimension_numbers<[1], [0], [0], [1], [0, 0, 1, 1], [], []>} : vector<128x128xbf16>, vector<128x128xbf16>, vector<128x128xf32> -> vector<128x128xf32>
    %5 = arith.truncf %4 : vector<128x128xf32> to vector<128x128xbf16>
    %cst_6 = arith.constant dense<0.000000e+00> : vector<128x128xf32>
    %6 = tpu.matmul %0, %5, %cst_6 {dimension_numbers = #tpu.dot_dimension_numbers<[1], [0], [0], [1], [0, 0, 1, 1], [], []>} : vector<128x128xbf16>, vector<128x128xbf16>, vector<128x128xf32> -> vector<128x128xf32>
    %c0_7 = arith.constant 0 : index
    %c0_8 = arith.constant 0 : index
    %7 = vector.load %arg3[%c0_7, %c0_8] : memref<3x128xf32, #tpu.memory_space<vmem>>, vector<1x128xf32>
    %8 = vector.broadcast %7 : vector<1x128xf32> to vector<128x128xf32>
    %9 = arith.addf %6, %8 : vector<128x128xf32>
    %cst_9 = arith.constant 0.000000e+00 : f32
    %10 = vector.broadcast %cst_9 : f32 to vector<128x128xf32>
    %11 = arith.maximumf %9, %10 : vector<128x128xf32>
    %12 = arith.truncf %11 : vector<128x128xf32> to vector<128x128xbf16>
    %c1 = arith.constant 1 : index
    %c0_10 = arith.constant 0 : index
    %c0_11 = arith.constant 0 : index
    %13 = vector.load %arg2[%c1, %c0_10, %c0_11] : memref<3x128x128xbf16, #tpu.memory_space<vmem>>, vector<1x128x128xbf16>
    %14 = vector.shape_cast %13 : vector<1x128x128xbf16> to vector<128x128xbf16>
    %cst_12 = arith.constant dense<0.000000e+00> : vector<128x128xf32>
    %15 = tpu.matmul %12, %14, %cst_12 {dimension_numbers = #tpu.dot_dimension_numbers<[1], [0], [0], [1], [0, 0, 1, 1], [], []>} : vector<128x128xbf16>, vector<128x128xbf16>, vector<128x128xf32> -> vector<128x128xf32>
    %16 = arith.truncf %15 : vector<128x128xf32> to vector<128x128xbf16>
    %cst_13 = arith.constant dense<0.000000e+00> : vector<128x128xf32>
    %17 = tpu.matmul %0, %16, %cst_13 {dimension_numbers = #tpu.dot_dimension_numbers<[1], [0], [0], [1], [0, 0, 1, 1], [], []>} : vector<128x128xbf16>, vector<128x128xbf16>, vector<128x128xf32> -> vector<128x128xf32>
    %c1_14 = arith.constant 1 : index
    %c0_15 = arith.constant 0 : index
    %18 = vector.load %arg3[%c1_14, %c0_15] : memref<3x128xf32, #tpu.memory_space<vmem>>, vector<1x128xf32>
    %19 = vector.broadcast %18 : vector<1x128xf32> to vector<128x128xf32>
    %20 = arith.addf %17, %19 : vector<128x128xf32>
    %cst_16 = arith.constant 0.000000e+00 : f32
    %21 = vector.broadcast %cst_16 : f32 to vector<128x128xf32>
    %22 = arith.maximumf %20, %21 : vector<128x128xf32>
    %23 = arith.truncf %22 : vector<128x128xf32> to vector<128x128xbf16>
    %c2 = arith.constant 2 : index
    %c0_17 = arith.constant 0 : index
    %c0_18 = arith.constant 0 : index
    %24 = vector.load %arg2[%c2, %c0_17, %c0_18] : memref<3x128x128xbf16, #tpu.memory_space<vmem>>, vector<1x128x128xbf16>
    %25 = vector.shape_cast %24 : vector<1x128x128xbf16> to vector<128x128xbf16>
    %cst_19 = arith.constant dense<0.000000e+00> : vector<128x128xf32>
    %26 = tpu.matmul %23, %25, %cst_19 {dimension_numbers = #tpu.dot_dimension_numbers<[1], [0], [0], [1], [0, 0, 1, 1], [], []>} : vector<128x128xbf16>, vector<128x128xbf16>, vector<128x128xf32> -> vector<128x128xf32>
    %27 = arith.truncf %26 : vector<128x128xf32> to vector<128x128xbf16>
    %cst_20 = arith.constant dense<0.000000e+00> : vector<128x128xf32>
    %28 = tpu.matmul %0, %27, %cst_20 {dimension_numbers = #tpu.dot_dimension_numbers<[1], [0], [0], [1], [0, 0, 1, 1], [], []>} : vector<128x128xbf16>, vector<128x128xbf16>, vector<128x128xf32> -> vector<128x128xf32>
    %c2_21 = arith.constant 2 : index
    %c0_22 = arith.constant 0 : index
    %29 = vector.load %arg3[%c2_21, %c0_22] : memref<3x128xf32, #tpu.memory_space<vmem>>, vector<1x128xf32>
    %30 = vector.broadcast %29 : vector<1x128xf32> to vector<128x128xf32>
    %31 = arith.addf %28, %30 : vector<128x128xf32>
    %c0_23 = arith.constant 0 : index
    %c0_24 = arith.constant 0 : index
    %32 = vector.load %arg4[%c0_23, %c0_24] : memref<8x128xbf16, #tpu.memory_space<vmem>>, vector<8x128xbf16>
    %33 = arith.truncf %31 : vector<128x128xf32> to vector<128x128xbf16>
    %cst_25 = arith.constant dense<0.000000e+00> : vector<8x128xf32>
    %34 = tpu.matmul %32, %33, %cst_25 {dimension_numbers = #tpu.dot_dimension_numbers<[1], [0], [0], [1], [0, 0, 1, 1], [], []>} : vector<8x128xbf16>, vector<128x128xbf16>, vector<8x128xf32> -> vector<8x128xf32>
    %c0_26 = arith.constant 0 : index
    %c0_27 = arith.constant 0 : index
    %35 = vector.load %arg5[%c0_26, %c0_27] : memref<8x128xf32, #tpu.memory_space<vmem>>, vector<8x128xf32>
    tpu.vector_store %arg5[%c0_26, %c0_27], %34 {strides = array<i32>} : memref<8x128xf32, #tpu.memory_space<vmem>>, vector<8x128xf32>,
    return
  }
}

</mosaic_0001>

<bundles_post_ra>
// kernel: tpu_custom_call.1
= control target key start
LH: loop header
LB: loop body
LE: loop exit
PB: predicated region body
PF: predicated region fallthrough
CT: control target
= control target key end

     0   :  { %10 = vsyncpa [#allocation3], 0  ;;  %s1306_s0 = inlined_call_operand.hbm [shape: bf16[128,128], index: 0, kind: input, shape index: {}]   ;;  %s1307_s1 = inlined_call_operand.hbm [shape: bf16[128,128], index: 1, kind: input, shape index: {}]   ;;  %s1308_s2 = inlined_call_operand.hbm [shape: bf16[3,128,128], index: 2, kind: input, shape index: {}]   ;;  %s1309_s3 = inlined_call_operand.hbm [shape: f32[3,128], index: 3, kind: input, shape index: {}]   ;;  %s1310_s4 = inlined_call_operand.hbm [shape: bf16[8,128], index: 4, kind: input, shape index: {}]   ;;  %s1311_s5 = inlined_call_operand.hbm [shape: f32[8,128], index: 5, kind: output, shape index: {}]  }
   0x1   :  { %11 = vsyncpa [#allocation6], 0 }
   0x2   :  { %12 = vsyncpa [#allocation9], 0 }
   0x3   :  { %13 = vsyncpa [#allocation4], 0  ;;  %s31_s20 = sshll.u32 %s1307_s1, 4  ;;  %s1210_s21 = smov [#allocation5]   ;;  %s32_s20 = int_to_ptr.hbm [resolvable:$true] %s31_s20 }
   0x4   :  { %s33_s22 = sshll.u32 %s1210_s21, 4  ;;  %s58_s25 = sshll.u32 %s1309_s3, 4  ;;  %s34_s22 = int_to_ptr.vmem [resolvable:$true] %s33_s22  ;;  %s59_s25 = int_to_ptr.hbm [resolvable:$true] %s58_s25 }
   0x5   :  { %s1211_s26 = smov 64   ;;  %s1212_s27 = smov 4  }
   0x6   :  { %39 = dma.hbm_to_vmem [thread:$0]  %s32_s20, 1024, %s34_s22, [#allocation6], %s1211_s26, %s1211_s26, %s1212_s27  }
   0x7   :  { %s1213_s28 = smov [#allocation8]   ;;  %s18_s7 = sshll.u32 %s1306_s0, 4  ;;  %s19_s7 = int_to_ptr.hbm [resolvable:$true] %s18_s7 }
   0x8   :  { %s60_s29 = sshll.u32 %s1213_s28, 4  ;;  %s44_s9 = sshll.u32 %s1308_s2, 4  ;;  %s61_s29 = int_to_ptr.vmem [resolvable:$true] %s60_s29  ;;  %s45_s9 = int_to_ptr.hbm [resolvable:$true] %s44_s9 }
   0x9   :  { %63 = dma.hbm_to_vmem [thread:$0]  %s59_s25, 64, %s61_s29, [#allocation9]  }
   0xa   :  { %s1214_s10 = smov [#allocation2]   ;;  %s1215_s3 = smov [#allocation7]  }
   0xb   :  { %s20_s11 = sshll.u32 %s1214_s10, 4  ;;  %s46_s12 = sshll.u32 %s1215_s3, 4  ;;  %s21_s11 = int_to_ptr.vmem [resolvable:$true] %s20_s11  ;;  %s47_s12 = int_to_ptr.vmem [resolvable:$true] %s46_s12 }
   0xc   :  { %26 = dma.hbm_to_vmem [thread:$0]  %s19_s7, 1024, %s21_s11, [#allocation3], %s1211_s26, %s1211_s26, %s1212_s27  }
   0xd   :  { %s69_s15 = sshll.u32 %s1310_s4, 4  ;;  %s1216_s0 = smov [#allocation10]   ;;  %s70_s15 = int_to_ptr.hbm [resolvable:$true] %s69_s15 }
   0xe   :  { %52 = dma.hbm_to_vmem [thread:$0]  %s45_s9, 3072, %s47_s12, [#allocation6], %s1211_s26, %s1211_s26, %s1212_s27  }
   0xf   :  { %s71_s16 = sshll.u32 %s1216_s0, 4  ;;  %s72_s16 = int_to_ptr.vmem [resolvable:$true] %s71_s16 }
  0x10   :  { %74 = dma.hbm_to_vmem [thread:$0]  %s70_s15, 64, %s72_s16, [#allocation9]  }
  0x11   :  { %1202 = dma.done.wait [#allocation3], 1024  }
  0x12   :  { %1203 = vsyncadd [#allocation3], 4294966272 }
  0x13   :  { %1204 = dma.done.wait [#allocation6], 4096  }
  0x14   :  { %1205 = vsyncadd [#allocation6], 4294963200 }
  0x15   :  { %1206 = dma.done.wait [#allocation9], 128  }
  0x16   :  { %1207 = vsyncadd [#allocation9], 4294967168  ;;  %v1014_v0 = vld [vmem:[#allocation7 + $0x38] sm:$0xff]  ;;  %v1013_v1 = vld [vmem:[#allocation7 + $0x30] sm:$0xff]  ;;  %s1217_s2 = smov [#allocation11]   ;;  %s819_s19 = sshll.u32 %s1311_s5, 4  ;;  %s820_s19 = int_to_ptr.hbm [resolvable:$true] %s819_s19 }
  0x17   :  { %239 = vmatpush.bf16.msra.mxu0 %v1014_v0  ;;  %1031 = vmatpush.bf16.msra.mxu3 %v1014_v0  ;;  %v1012_v2 = vld [vmem:[#allocation7 + $0x28] sm:$0xff]  ;;  %v1011_v3 = vld [vmem:[#allocation7 + $0x20] sm:$0xff]  ;;  %v1010_v4 = vld [vmem:[#allocation7 + $0x18] sm:$0xff]  ;;  %s817_s4 = sshll.u32 %s1217_s2, 4  ;;  %s818_s4 = int_to_ptr.vmem [resolvable:$true] %s817_s4 }
  0x18   :  { %v1009_v5 = vld [vmem:[#allocation7 + $0x10] sm:$0xff]  ;;  %v1008_v6 = vld [vmem:[#allocation7 + $0x8] sm:$0xff]  ;;  %v1007_v7 = vld [vmem:[#allocation7] sm:$0xff] }
  0x19   :  { %v999_v8 = vld [vmem:[#allocation5] sm:$0xff]  ;;  %v1004_v9 = vld [vmem:[#allocation5 + $0x28] sm:$0xff]  ;;  %v1005_v11 = vld [vmem:[#allocation5 + $0x30] sm:$0xff] }
  0x1a   :  { %v1000_v10 = vld [vmem:[#allocation5 + $0x8] sm:$0xff]  ;;  %v1001_v12 = vld [vmem:[#allocation5 + $0x10] sm:$0xff]  ;;  %v1006_v13 = vld [vmem:[#allocation5 + $0x38] sm:$0xff] }
  0x1b   :  { %240 = vmatpush.bf16.msra.mxu0 %v1013_v1  ;;  %1032 = vmatpush.bf16.msra.mxu3 %v1013_v1  ;;  %v1002_v14 = vld [vmem:[#allocation5 + $0x18] sm:$0xff]  ;;  %v1003_v15 = vld [vmem:[#allocation5 + $0x20] sm:$0xff]  ;;  %v1266_v41 = vld [vmem:[#allocation2 + $0x8] sm:$0xff] }
  0x1c   :  { %v1263_v40 = vld [vmem:[#allocation2] sm:$0xff]  ;;  %v1269_v42 = vld [vmem:[#allocation2 + $0x10] sm:$0xff]  ;;  %v1272_v43 = vld [vmem:[#allocation2 + $0x28] sm:$0xff] }
  0x1d   :  { %v1022_v44 = vld [vmem:[#allocation7 + $0x78] sm:$0xff]  ;;  %v1021_v45 = vld [vmem:[#allocation7 + $0x70] sm:$0xff]  ;;  %v1020_v46 = vld [vmem:[#allocation7 + $0x68] sm:$0xff] }
  0x1e   :  { %v1275_v47 = vld [vmem:[#allocation2 + $0x18] sm:$0xff]  ;;  %v1019_v48 = vld [vmem:[#allocation7 + $0x60] sm:$0xff]  ;;  %v1277_v49 = vld [vmem:[#allocation2 + $0x30] sm:$0xff] }
  0x1f   :  { %241 = vmatpush.bf16.msra.mxu0 %v1012_v2  ;;  %1033 = vmatpush.bf16.msra.mxu3 %v1012_v2  ;;  %v1281_v50 = vld [vmem:[#allocation2 + $0x20] sm:$0xff]  ;;  %v1283_v51 = vld [vmem:[#allocation2 + $0x38] sm:$0xff]  ;;  %v1017_v53 = vld [vmem:[#allocation7 + $0x50] sm:$0xff] }
  0x20   :  { %v1018_v52 = vld [vmem:[#allocation7 + $0x58] sm:$0xff]  ;;  %v1016_v54 = vld [vmem:[#allocation7 + $0x48] sm:$0xff]  ;;  %v1015_v55 = vld [vmem:[#allocation7 + $0x40] sm:$0xff] }
  0x21   :  { %v1055_v57 = vld [vmem:[#allocation8] ss:$0 sm:$0xff] }
  0x23   :  { %242 = vmatpush.bf16.msra.mxu0 %v1011_v3  ;;  %1034 = vmatpush.bf16.msra.mxu3 %v1011_v3 }
  0x27   :  { %243 = vmatpush.bf16.msra.mxu0 %v1010_v4  ;;  %1035 = vmatpush.bf16.msra.mxu3 %v1010_v4 }
  0x2b   :  { %244 = vmatpush.bf16.msra.mxu0 %v1009_v5  ;;  %1036 = vmatpush.bf16.msra.mxu3 %v1009_v5 }
  0x2f   :  { %245 = vmatpush.bf16.msra.mxu0 %v1008_v6  ;;  %1037 = vmatpush.bf16.msra.mxu3 %v1008_v6 }
  0x33   :  { %246 = vmatpush.bf16.msra.mxu0 %v1007_v7  ;;  %1038 = vmatpush.bf16.msra.mxu3 %v1007_v7 }
  0x36   :  { %247 = vmatmul.bf16.vlgmr.msra.gmra.mxu0 %v999_v8  ;;  %272 = vmatmul.bf16.vlgmr.msra.gmra.mxu3 %v1004_v9 }
  0x46   :  { %252 = vmatmul.bf16.gmra.mxu0 %v1000_v10  ;;  %277 = vmatmul.bf16.gmra.mxu3 %v1005_v11 }
  0x56   :  { %257 = vmatmul.bf16.gmra.mxu0 %v1001_v12  ;;  %282 = vmatmul.bf16.gmra.mxu3 %v1006_v13 }
  0x66   :  { %262 = vmatmul.bf16.gmra.mxu0 %v1002_v14 }
  0x76   :  { %267 = vmatmul.bf16.gmra.mxu0 %v1003_v15 }
  0xb3   :  { %v248_v16 = vpop.f32.mrf.mxu0 }
  0xb9   :  { %v273_v17 = vpop.f32.mrf.mxu3 }
  0xbb   :  { %v250_v18 = vpop.f32.mrf.mxu0 }
  0xbc   :  { %v288_v39 = vpack.c.bf16 %v250_v18, %v248_v16 }
  0xc1   :  { %v275_v19 = vpop.f32.mrf.mxu3 }
  0xc2   :  { %v293_v31 = vpack.c.bf16 %v275_v19, %v273_v17 }
  0xc3   :  { %v253_v20 = vpop.f32.mrf.mxu0 }
  0xc9   :  { %v278_v21 = vpop.f32.mrf.mxu3 }
  0xcb   :  { %v255_v22 = vpop.f32.mrf.mxu0 }
  0xcc   :  { %v289_v38 = vpack.c.bf16 %v255_v22, %v253_v20 }
  0xd1   :  { %v280_v23 = vpop.f32.mrf.mxu3 }
  0xd2   :  { %v294_v30 = vpack.c.bf16 %v280_v23, %v278_v21 }
  0xd3   :  { %v258_v24 = vpop.f32.mrf.mxu0 }
  0xd9   :  { %v283_v25 = vpop.f32.mrf.mxu3 }
  0xdb   :  { %v260_v26 = vpop.f32.mrf.mxu0 }
  0xdc   :  { %v290_v37 = vpack.c.bf16 %v260_v26, %v258_v24 }
  0xe1   :  { %v285_v27 = vpop.f32.mrf.mxu3 }
  0xe2   :  { %v295_v28 = vpack.c.bf16 %v285_v27, %v283_v25 }
  0xe3   :  { %v263_v29 = vpop.f32.mrf.mxu0 }
  0xe4   :  { %346 = vmatpush.bf16.msra.mxu1 %v295_v28  ;;  %1039 = vmatpush.bf16.msra.mxu2 %v295_v28 }
  0xe8   :  { %347 = vmatpush.bf16.msra.mxu1 %v294_v30  ;;  %1040 = vmatpush.bf16.msra.mxu2 %v294_v30 }
  0xeb   :  { %v265_v32 = vpop.f32.mrf.mxu0 }
  0xec   :  { %348 = vmatpush.bf16.msra.mxu1 %v293_v31  ;;  %1041 = vmatpush.bf16.msra.mxu2 %v293_v31  ;;  %v291_v36 = vpack.c.bf16 %v265_v32, %v263_v29 }
  0xf3   :  { %v268_v33 = vpop.f32.mrf.mxu0 }
  0xfb   :  { %v270_v34 = vpop.f32.mrf.mxu0 }
  0xfc   :  { %v292_v35 = vpack.c.bf16 %v270_v34, %v268_v33 }
  0xfe   :  { %349 = vmatpush.bf16.msra.mxu1 %v292_v35  ;;  %1042 = vmatpush.bf16.msra.mxu2 %v292_v35 }
 0x102   :  { %350 = vmatpush.bf16.msra.mxu1 %v291_v36  ;;  %1043 = vmatpush.bf16.msra.mxu2 %v291_v36 }
 0x106   :  { %351 = vmatpush.bf16.msra.mxu1 %v290_v37  ;;  %1044 = vmatpush.bf16.msra.mxu2 %v290_v37 }
 0x10a   :  { %352 = vmatpush.bf16.msra.mxu1 %v289_v38  ;;  %1045 = vmatpush.bf16.msra.mxu2 %v289_v38 }
 0x10e   :  { %353 = vmatpush.bf16.msra.mxu1 %v288_v39  ;;  %1046 = vmatpush.bf16.msra.mxu2 %v288_v39 }
 0x111   :  { %354 = vmatmul.bf16.vlgmr.msra.gmra.mxu1 %v1263_v40  ;;  %379 = vmatmul.bf16.vlgmr.msra.gmra.mxu2 %v1272_v43 }
 0x112   :  { %484 = vmatpush.bf16.msrb.mxu2 %v1022_v44 }
 0x116   :  { %485 = vmatpush.bf16.msrb.mxu2 %v1021_v45 }
 0x11a   :  { %486 = vmatpush.bf16.msrb.mxu2 %v1020_v46 }
 0x11e   :  { %487 = vmatpush.bf16.msrb.mxu2 %v1019_v48 }
 0x121   :  { %359 = vmatmul.bf16.gmra.mxu1 %v1266_v41  ;;  %384 = vmatmul.bf16.gmra.mxu2 %v1277_v49 }
 0x122   :  { %488 = vmatpush.bf16.msrb.mxu2 %v1018_v52 }
 0x126   :  { %489 = vmatpush.bf16.msrb.mxu2 %v1017_v53 }
 0x12a   :  { %490 = vmatpush.bf16.msrb.mxu2 %v1016_v54 }
 0x12e   :  { %491 = vmatpush.bf16.msrb.mxu2 %v1015_v55 }
 0x131   :  { %364 = vmatmul.bf16.gmra.mxu1 %v1269_v42  ;;  %389 = vmatmul.bf16.gmra.mxu2 %v1283_v51 }
 0x141   :  { %369 = vmatmul.bf16.gmra.mxu1 %v1275_v47 }
 0x151   :  { %374 = vmatmul.bf16.gmra.mxu1 %v1281_v50 }
 0x18e   :  { %v355_v56 = vpop.f32.mrf.mxu1 }
 0x18f   :  { %v356_v58 = vadd.f32 %v1055_v57, %v355_v56 }
 0x191   :  { %v395_v61 = vmax.f32 %v356_v58, 0.0 }
 0x194   :  { %v380_v22 = vpop.f32.mrf.mxu2 }
 0x195   :  { %v381_v31 = vadd.f32 %v1055_v57, %v380_v22  ;;  %v1025_v22 = vld [vmem:[#allocation7 + $0x90] sm:$0xff] }
 0x196   :  { %v357_v59 = vpop.f32.mrf.mxu1 }
 0x197   :  { %v358_v60 = vadd.f32 %v1055_v57, %v357_v59  ;;  %v405_v33 = vmax.f32 %v381_v31, 0.0 }
 0x199   :  { %v396_v62 = vmax.f32 %v358_v60, 0.0 }
 0x19b   :  { %v411_v63 = vpack.c.bf16 %v396_v62, %v395_v61 }
 0x19c   :  { %v382_v26 = vpop.f32.mrf.mxu2 }
 0x19d   :  { %492 = vmatmul.bf16.vlgmr.msrb.gmra.mxu2 %v411_v63  ;;  %v383_v32 = vadd.f32 %v1055_v57, %v382_v26  ;;  %v1056_v26 = vld [vmem:[#allocation8 + $0x1] ss:$0 sm:$0xff] }
 0x19e   :  { %v360_v0 = vpop.f32.mrf.mxu1 }
 0x19f   :  { %v361_v1 = vadd.f32 %v1055_v57, %v360_v0  ;;  %v406_v34 = vmax.f32 %v383_v32, 0.0 }
 0x1a1   :  { %v397_v4 = vmax.f32 %v361_v1, 0.0  ;;  %v416_v35 = vpack.c.bf16 %v406_v34, %v405_v33 }
 0x1a4   :  { %v385_v30 = vpop.f32.mrf.mxu2 }
 0x1a5   :  { %v386_v37 = vadd.f32 %v1055_v57, %v385_v30 }
 0x1a6   :  { %v362_v2 = vpop.f32.mrf.mxu1 }
 0x1a7   :  { %v363_v3 = vadd.f32 %v1055_v57, %v362_v2  ;;  %v407_v44 = vmax.f32 %v386_v37, 0.0 }
 0x1a9   :  { %v398_v5 = vmax.f32 %v363_v3, 0.0 }
 0x1ab   :  { %v412_v6 = vpack.c.bf16 %v398_v5, %v397_v4 }
 0x1ac   :  { %v387_v36 = vpop.f32.mrf.mxu2 }
 0x1ad   :  { %497 = vmatmul.bf16.gmra.mxu2 %v412_v6  ;;  %v388_v38 = vadd.f32 %v1055_v57, %v387_v36 }
 0x1ae   :  { %v365_v7 = vpop.f32.mrf.mxu1 }
 0x1af   :  { %v366_v8 = vadd.f32 %v1055_v57, %v365_v7  ;;  %v408_v45 = vmax.f32 %v388_v38, 0.0 }
 0x1b1   :  { %v399_v11 = vmax.f32 %v366_v8, 0.0  ;;  %v417_v46 = vpack.c.bf16 %v408_v45, %v407_v44 }
 0x1b4   :  { %v390_v39 = vpop.f32.mrf.mxu2 }
 0x1b5   :  { %v391_v52 = vadd.f32 %v1055_v57, %v390_v39 }
 0x1b6   :  { %v367_v9 = vpop.f32.mrf.mxu1 }
 0x1b7   :  { %v368_v10 = vadd.f32 %v1055_v57, %v367_v9  ;;  %v409_v54 = vmax.f32 %v391_v52, 0.0 }
 0x1b9   :  { %v400_v12 = vmax.f32 %v368_v10, 0.0 }
 0x1bb   :  { %v413_v13 = vpack.c.bf16 %v400_v12, %v399_v11 }
 0x1bc   :  { %v392_v48 = vpop.f32.mrf.mxu2 }
 0x1bd   :  { %502 = vmatmul.bf16.gmra.mxu2 %v413_v13  ;;  %v393_v53 = vadd.f32 %v1055_v57, %v392_v48 }
 0x1be   :  { %v370_v14 = vpop.f32.mrf.mxu1 }
 0x1bf   :  { %v371_v15 = vadd.f32 %v1055_v57, %v370_v14  ;;  %v410_v55 = vmax.f32 %v393_v53, 0.0 }
 0x1c1   :  { %v401_v18 = vmax.f32 %v371_v15, 0.0  ;;  %v418_v56 = vpack.c.bf16 %v410_v55, %v409_v54 }
 0x1c6   :  { %v372_v16 = vpop.f32.mrf.mxu1 }
 0x1c7   :  { %v373_v17 = vadd.f32 %v1055_v57, %v372_v16 }
 0x1c9   :  { %v402_v19 = vmax.f32 %v373_v17, 0.0  ;;  %v1030_v17 = vld [vmem:[#allocation7 + $0xb8] sm:$0xff] }
 0x1ca   :  { %681 = vmatpush.bf16.msrb.mxu0 %v1030_v17 }
 0x1cb   :  { %v414_v20 = vpack.c.bf16 %v402_v19, %v401_v18  ;;  %v1029_v18 = vld [vmem:[#allocation7 + $0xb0] sm:$0xff]  ;;  %v1028_v19 = vld [vmem:[#allocation7 + $0xa8] sm:$0xff] }
 0x1cd   :  { %507 = vmatmul.bf16.gmra.mxu2 %v414_v20  ;;  %v1027_v20 = vld [vmem:[#allocation7 + $0xa0] sm:$0xff] }
 0x1ce   :  { %v375_v21 = vpop.f32.mrf.mxu1  ;;  %682 = vmatpush.bf16.msrb.mxu0 %v1029_v18 }
 0x1cf   :  { %v376_v23 = vadd.f32 %v1055_v57, %v375_v21  ;;  %v1026_v21 = vld [vmem:[#allocation7 + $0x98] sm:$0xff] }
 0x1d1   :  { %v403_v27 = vmax.f32 %v376_v23, 0.0  ;;  %v1024_v23 = vld [vmem:[#allocation7 + $0x88] sm:$0xff] }
 0x1d2   :  { %683 = vmatpush.bf16.msrb.mxu0 %v1028_v19 }
 0x1d6   :  { %v377_v24 = vpop.f32.mrf.mxu1  ;;  %684 = vmatpush.bf16.msrb.mxu0 %v1027_v20 }
 0x1d7   :  { %v378_v25 = vadd.f32 %v1055_v57, %v377_v24  ;;  %v1023_v24 = vld [vmem:[#allocation7 + $0x80] sm:$0xff] }
 0x1d9   :  { %v404_v28 = vmax.f32 %v378_v25, 0.0 }
 0x1da   :  { %685 = vmatpush.bf16.msrb.mxu0 %v1026_v21 }
 0x1db   :  { %v415_v29 = vpack.c.bf16 %v404_v28, %v403_v27 }
 0x1dd   :  { %512 = vmatmul.bf16.gmra.mxu2 %v415_v29 }
 0x1de   :  { %686 = vmatpush.bf16.msrb.mxu0 %v1025_v22 }
 0x1e2   :  { %687 = vmatpush.bf16.msrb.mxu0 %v1024_v23 }
 0x1e6   :  { %688 = vmatpush.bf16.msrb.mxu0 %v1023_v24 }
 0x1ed   :  { %517 = vmatmul.bf16.gmra.mxu2 %v416_v35 }
 0x1fd   :  { %522 = vmatmul.bf16.gmra.mxu2 %v417_v46 }
 0x20d   :  { %527 = vmatmul.bf16.gmra.mxu2 %v418_v56 }
 0x220   :  { %v493_v58 = vpop.f32.mrf.mxu2 }
 0x228   :  { %v495_v59 = vpop.f32.mrf.mxu2 }
 0x229   :  { %v533_v60 = vpack.c.bf16 %v495_v59, %v493_v58 }
 0x230   :  { %v498_v61 = vpop.f32.mrf.mxu2 }
 0x238   :  { %v500_v62 = vpop.f32.mrf.mxu2 }
 0x239   :  { %v534_v63 = vpack.c.bf16 %v500_v62, %v498_v61 }
 0x240   :  { %v503_v0 = vpop.f32.mrf.mxu2 }
 0x248   :  { %v505_v1 = vpop.f32.mrf.mxu2 }
 0x249   :  { %v535_v2 = vpack.c.bf16 %v505_v1, %v503_v0 }
 0x250   :  { %v508_v3 = vpop.f32.mrf.mxu2 }
 0x258   :  { %v510_v4 = vpop.f32.mrf.mxu2 }
 0x259   :  { %v536_v5 = vpack.c.bf16 %v510_v4, %v508_v3 }
 0x260   :  { %v513_v6 = vpop.f32.mrf.mxu2 }
 0x268   :  { %v515_v7 = vpop.f32.mrf.mxu2 }
 0x269   :  { %v537_v16 = vpack.c.bf16 %v515_v7, %v513_v6 }
 0x270   :  { %v518_v8 = vpop.f32.mrf.mxu2 }
 0x278   :  { %v520_v57 = vpop.f32.mrf.mxu2 }
 0x279   :  { %v538_v15 = vpack.c.bf16 %v520_v57, %v518_v8 }
 0x280   :  { %v523_v9 = vpop.f32.mrf.mxu2 }
 0x288   :  { %v525_v10 = vpop.f32.mrf.mxu2 }
 0x289   :  { %v539_v14 = vpack.c.bf16 %v525_v10, %v523_v9 }
 0x290   :  { %v528_v11 = vpop.f32.mrf.mxu2 }
 0x298   :  { %v530_v12 = vpop.f32.mrf.mxu2 }
 0x299   :  { %v540_v13 = vpack.c.bf16 %v530_v12, %v528_v11 }
 0x29b   :  { %543 = vmatpush.bf16.msrb.mxu3 %v540_v13 }
 0x29f   :  { %544 = vmatpush.bf16.msrb.mxu3 %v539_v14 }
 0x2a3   :  { %545 = vmatpush.bf16.msrb.mxu3 %v538_v15 }
 0x2a7   :  { %546 = vmatpush.bf16.msrb.mxu3 %v537_v16 }
 0x2ab   :  { %547 = vmatpush.bf16.msrb.mxu3 %v536_v5 }
 0x2af   :  { %548 = vmatpush.bf16.msrb.mxu3 %v535_v2 }
 0x2b3   :  { %549 = vmatpush.bf16.msrb.mxu3 %v534_v63 }
 0x2b7   :  { %550 = vmatpush.bf16.msrb.mxu3 %v533_v60 }
 0x2ba   :  { %551 = vmatmul.bf16.vlgmr.msrb.gmra.mxu3 %v1263_v40 }
 0x2ca   :  { %556 = vmatmul.bf16.gmra.mxu3 %v1266_v41 }
 0x2da   :  { %561 = vmatmul.bf16.gmra.mxu3 %v1269_v42 }
 0x2ea   :  { %566 = vmatmul.bf16.gmra.mxu3 %v1275_v47 }
 0x2fa   :  { %571 = vmatmul.bf16.gmra.mxu3 %v1281_v50 }
 0x30a   :  { %576 = vmatmul.bf16.gmra.mxu3 %v1272_v43 }
 0x31a   :  { %581 = vmatmul.bf16.gmra.mxu3 %v1277_v49 }
 0x32a   :  { %586 = vmatmul.bf16.gmra.mxu3 %v1283_v51 }
 0x33d   :  { %v552_v25 = vpop.f32.mrf.mxu3 }
 0x33e   :  { %v553_v27 = vadd.f32 %v1056_v26, %v552_v25 }
 0x340   :  { %v592_v30 = vmax.f32 %v553_v27, 0.0 }
 0x345   :  { %v554_v28 = vpop.f32.mrf.mxu3 }
 0x346   :  { %v555_v29 = vadd.f32 %v1056_v26, %v554_v28 }
 0x348   :  { %v593_v31 = vmax.f32 %v555_v29, 0.0 }
 0x34a   :  { %v608_v32 = vpack.c.bf16 %v593_v31, %v592_v30 }
 0x34c   :  { %689 = vmatmul.bf16.vlgmr.msrb.gmra.mxu0 %v608_v32 }
 0x34d   :  { %v557_v33 = vpop.f32.mrf.mxu3 }
 0x34e   :  { %v558_v34 = vadd.f32 %v1056_v26, %v557_v33 }
 0x350   :  { %v594_v37 = vmax.f32 %v558_v34, 0.0 }
 0x355   :  { %v559_v35 = vpop.f32.mrf.mxu3 }
 0x356   :  { %v560_v36 = vadd.f32 %v1056_v26, %v559_v35 }
 0x358   :  { %v595_v38 = vmax.f32 %v560_v36, 0.0 }
 0x35a   :  { %v609_v39 = vpack.c.bf16 %v595_v38, %v594_v37 }
 0x35c   :  { %694 = vmatmul.bf16.gmra.mxu0 %v609_v39 }
 0x35d   :  { %v562_v44 = vpop.f32.mrf.mxu3 }
 0x35e   :  { %v563_v45 = vadd.f32 %v1056_v26, %v562_v44 }
 0x360   :  { %v596_v52 = vmax.f32 %v563_v45, 0.0 }
 0x365   :  { %v564_v46 = vpop.f32.mrf.mxu3 }
 0x366   :  { %v565_v48 = vadd.f32 %v1056_v26, %v564_v46 }
 0x368   :  { %v597_v53 = vmax.f32 %v565_v48, 0.0 }
 0x36a   :  { %v610_v54 = vpack.c.bf16 %v597_v53, %v596_v52 }
 0x36c   :  { %699 = vmatmul.bf16.gmra.mxu0 %v610_v54 }
 0x36d   :  { %v567_v55 = vpop.f32.mrf.mxu3 }
 0x36e   :  { %v568_v56 = vadd.f32 %v1056_v26, %v567_v55 }
 0x370   :  { %v598_v60 = vmax.f32 %v568_v56, 0.0 }
 0x375   :  { %v569_v58 = vpop.f32.mrf.mxu3 }
 0x376   :  { %v570_v59 = vadd.f32 %v1056_v26, %v569_v58 }
 0x378   :  { %v599_v61 = vmax.f32 %v570_v59, 0.0 }
 0x37a   :  { %v611_v62 = vpack.c.bf16 %v599_v61, %v598_v60  ;;  %v1057_v60 = vld [vmem:[#allocation8 + $0x2] ss:$0 sm:$0xff] }
 0x37c   :  { %704 = vmatmul.bf16.gmra.mxu0 %v611_v62 }
 0x37d   :  { %v572_v63 = vpop.f32.mrf.mxu3 }
 0x37e   :  { %v573_v0 = vadd.f32 %v1056_v26, %v572_v63 }
 0x380   :  { %v600_v3 = vmax.f32 %v573_v0, 0.0 }
 0x385   :  { %v574_v1 = vpop.f32.mrf.mxu3 }
 0x386   :  { %v575_v2 = vadd.f32 %v1056_v26, %v574_v1 }
 0x388   :  { %v601_v4 = vmax.f32 %v575_v2, 0.0 }
 0x38a   :  { %v612_v5 = vpack.c.bf16 %v601_v4, %v600_v3 }
 0x38c   :  { %709 = vmatmul.bf16.gmra.mxu0 %v612_v5 }
 0x38d   :  { %v577_v6 = vpop.f32.mrf.mxu3 }
 0x38e   :  { %v578_v7 = vadd.f32 %v1056_v26, %v577_v6 }
 0x390   :  { %v602_v9 = vmax.f32 %v578_v7, 0.0 }
 0x395   :  { %v579_v8 = vpop.f32.mrf.mxu3 }
 0x396   :  { %v580_v57 = vadd.f32 %v1056_v26, %v579_v8 }
 0x398   :  { %v603_v10 = vmax.f32 %v580_v57, 0.0 }
 0x39a   :  { %v613_v11 = vpack.c.bf16 %v603_v10, %v602_v9 }
 0x39c   :  { %714 = vmatmul.bf16.gmra.mxu0 %v613_v11 }
 0x39d   :  { %v582_v12 = vpop.f32.mrf.mxu3 }
 0x39e   :  { %v583_v13 = vadd.f32 %v1056_v26, %v582_v12 }
 0x3a0   :  { %v604_v16 = vmax.f32 %v583_v13, 0.0 }
 0x3a5   :  { %v584_v14 = vpop.f32.mrf.mxu3 }
 0x3a6   :  { %v585_v15 = vadd.f32 %v1056_v26, %v584_v14 }
 0x3a8   :  { %v605_v17 = vmax.f32 %v585_v15, 0.0 }
 0x3aa   :  { %v614_v18 = vpack.c.bf16 %v605_v17, %v604_v16 }
 0x3ac   :  { %719 = vmatmul.bf16.gmra.mxu0 %v614_v18 }
 0x3ad   :  { %v587_v19 = vpop.f32.mrf.mxu3 }
 0x3ae   :  { %v588_v20 = vadd.f32 %v1056_v26, %v587_v19 }
 0x3b0   :  { %v606_v23 = vmax.f32 %v588_v20, 0.0 }
 0x3b5   :  { %v589_v21 = vpop.f32.mrf.mxu3 }
 0x3b6   :  { %v590_v22 = vadd.f32 %v1056_v26, %v589_v21 }
 0x3b8   :  { %v607_v24 = vmax.f32 %v590_v22, 0.0 }
 0x3ba   :  { %v615_v25 = vpack.c.bf16 %v607_v24, %v606_v23 }
 0x3bc   :  { %724 = vmatmul.bf16.gmra.mxu0 %v615_v25 }
 0x3c9   :  { %v690_v27 = vpop.f32.mrf.mxu0 }
 0x3d1   :  { %v692_v28 = vpop.f32.mrf.mxu0 }
 0x3d2   :  { %v730_v29 = vpack.c.bf16 %v692_v28, %v690_v27  ;;  %v789_v28 = vld [vmem:[#allocation10] sm:$0xf] }
 0x3d9   :  { %v695_v30 = vpop.f32.mrf.mxu0 }
 0x3e1   :  { %v697_v31 = vpop.f32.mrf.mxu0 }
 0x3e2   :  { %v731_v32 = vpack.c.bf16 %v697_v31, %v695_v30 }
 0x3e9   :  { %v700_v33 = vpop.f32.mrf.mxu0 }
 0x3f1   :  { %v702_v34 = vpop.f32.mrf.mxu0 }
 0x3f2   :  { %v732_v35 = vpack.c.bf16 %v702_v34, %v700_v33 }
 0x3f9   :  { %v705_v36 = vpop.f32.mrf.mxu0 }
 0x401   :  { %v707_v37 = vpop.f32.mrf.mxu0 }
 0x402   :  { %v733_v38 = vpack.c.bf16 %v707_v37, %v705_v36 }
 0x409   :  { %v710_v39 = vpop.f32.mrf.mxu0 }
 0x411   :  { %v712_v44 = vpop.f32.mrf.mxu0 }
 0x412   :  { %v734_v58 = vpack.c.bf16 %v712_v44, %v710_v39 }
 0x419   :  { %v715_v45 = vpop.f32.mrf.mxu0 }
 0x421   :  { %v717_v26 = vpop.f32.mrf.mxu0 }
 0x422   :  { %v735_v56 = vpack.c.bf16 %v717_v26, %v715_v45 }
 0x429   :  { %v720_v46 = vpop.f32.mrf.mxu0 }
 0x431   :  { %v722_v48 = vpop.f32.mrf.mxu0 }
 0x432   :  { %v736_v55 = vpack.c.bf16 %v722_v48, %v720_v46 }
 0x439   :  { %v725_v52 = vpop.f32.mrf.mxu0 }
 0x441   :  { %v727_v53 = vpop.f32.mrf.mxu0 }
 0x442   :  { %v737_v54 = vpack.c.bf16 %v727_v53, %v725_v52 }
 0x444   :  { %740 = vmatpush.bf16.msrb.mxu1 %v737_v54 }
 0x448   :  { %741 = vmatpush.bf16.msrb.mxu1 %v736_v55 }
 0x44c   :  { %742 = vmatpush.bf16.msrb.mxu1 %v735_v56 }
 0x450   :  { %743 = vmatpush.bf16.msrb.mxu1 %v734_v58 }
 0x454   :  { %744 = vmatpush.bf16.msrb.mxu1 %v733_v38 }
 0x458   :  { %745 = vmatpush.bf16.msrb.mxu1 %v732_v35 }
 0x45c   :  { %746 = vmatpush.bf16.msrb.mxu1 %v731_v32 }
 0x460   :  { %747 = vmatpush.bf16.msrb.mxu1 %v730_v29 }
 0x463   :  { %748 = vmatmul.bf16.vlgmr.msrb.gmra.mxu1 %v1263_v40 }
 0x473   :  { %753 = vmatmul.bf16.gmra.mxu1 %v1266_v41 }
 0x483   :  { %758 = vmatmul.bf16.gmra.mxu1 %v1269_v42 }
 0x493   :  { %763 = vmatmul.bf16.gmra.mxu1 %v1275_v47 }
 0x4a3   :  { %768 = vmatmul.bf16.gmra.mxu1 %v1281_v50 }
 0x4b3   :  { %773 = vmatmul.bf16.gmra.mxu1 %v1272_v43 }
 0x4c3   :  { %778 = vmatmul.bf16.gmra.mxu1 %v1277_v49 }
 0x4d3   :  { %783 = vmatmul.bf16.gmra.mxu1 %v1283_v51 }
 0x4e0   :  { %v749_v59 = vpop.f32.mrf.mxu1 }
 0x4e1   :  { %v750_v62 = vadd.f32 %v1057_v60, %v749_v59 }
 0x4e8   :  { %v751_v61 = vpop.f32.mrf.mxu1 }
 0x4e9   :  { %v752_v63 = vadd.f32 %v1057_v60, %v751_v61 }
 0x4eb   :  { %v790_v40 = vpack.c.bf16 %v752_v63, %v750_v62 }
 0x4f0   :  { %v754_v0 = vpop.f32.mrf.mxu1 }
 0x4f1   :  { %v755_v1 = vadd.f32 %v1057_v60, %v754_v0 }
 0x4f8   :  { %v756_v41 = vpop.f32.mrf.mxu1 }
 0x4f9   :  { %v757_v42 = vadd.f32 %v1057_v60, %v756_v41 }
 0x4fb   :  { %v791_v2 = vpack.c.bf16 %v757_v42, %v755_v1 }
 0x500   :  { %v759_v47 = vpop.f32.mrf.mxu1 }
 0x501   :  { %v760_v50 = vadd.f32 %v1057_v60, %v759_v47 }
 0x508   :  { %v761_v3 = vpop.f32.mrf.mxu1 }
 0x509   :  { %v762_v4 = vadd.f32 %v1057_v60, %v761_v3 }
 0x50b   :  { %v792_v43 = vpack.c.bf16 %v762_v4, %v760_v50 }
 0x510   :  { %v764_v5 = vpop.f32.mrf.mxu1 }
 0x511   :  { %v765_v6 = vadd.f32 %v1057_v60, %v764_v5 }
 0x518   :  { %v766_v49 = vpop.f32.mrf.mxu1 }
 0x519   :  { %v767_v51 = vadd.f32 %v1057_v60, %v766_v49 }
 0x51b   :  { %v793_v7 = vpack.c.bf16 %v767_v51, %v765_v6 }
 0x520   :  { %v769_v8 = vpop.f32.mrf.mxu1 }
 0x521   :  { %v770_v25 = vadd.f32 %v1057_v60, %v769_v8 }
 0x528   :  { %v771_v57 = vpop.f32.mrf.mxu1 }
 0x529   :  { %v772_v23 = vadd.f32 %v1057_v60, %v771_v57 }
 0x52b   :  { %v794_v27 = vpack.c.bf16 %v772_v23, %v770_v25 }
 0x530   :  { %v774_v9 = vpop.f32.mrf.mxu1 }
 0x531   :  { %v775_v22 = vadd.f32 %v1057_v60, %v774_v9 }
 0x538   :  { %v776_v10 = vpop.f32.mrf.mxu1 }
 0x539   :  { %v777_v20 = vadd.f32 %v1057_v60, %v776_v10 }
 0x53b   :  { %v795_v24 = vpack.c.bf16 %v777_v20, %v775_v22 }
 0x540   :  { %v779_v11 = vpop.f32.mrf.mxu1 }
 0x541   :  { %v780_v19 = vadd.f32 %v1057_v60, %v779_v11 }
 0x548   :  { %v781_v12 = vpop.f32.mrf.mxu1 }
 0x549   :  { %v782_v17 = vadd.f32 %v1057_v60, %v781_v12 }
 0x54b   :  { %v796_v21 = vpack.c.bf16 %v782_v17, %v780_v19 }
 0x550   :  { %v784_v13 = vpop.f32.mrf.mxu1 }
 0x551   :  { %v785_v15 = vadd.f32 %v1057_v60, %v784_v13 }
 0x558   :  { %v786_v14 = vpop.f32.mrf.mxu1 }
 0x559   :  { %v787_v16 = vadd.f32 %v1057_v60, %v786_v14 }
 0x55b   :  { %v797_v18 = vpack.c.bf16 %v787_v16, %v785_v15 }
 0x55d   :  { %798 = vmatpush.bf16.msra.mxu2 %v797_v18 }
 0x561   :  { %799 = vmatpush.bf16.msra.mxu2 %v796_v21 }
 0x565   :  { %800 = vmatpush.bf16.msra.mxu2 %v795_v24 }
 0x569   :  { %801 = vmatpush.bf16.msra.mxu2 %v794_v27 }
 0x56d   :  { %802 = vmatpush.bf16.msra.mxu2 %v793_v7 }
 0x571   :  { %803 = vmatpush.bf16.msra.mxu2 %v792_v43 }
 0x575   :  { %804 = vmatpush.bf16.msra.mxu2 %v791_v2 }
 0x579   :  { %805 = vmatpush.bf16.msra.mxu2 %v790_v40 }
 0x57c   :  { %806 = vmatmul.bf16.vlgmr.msra.gmra.mxu2 %v789_v28 }
 0x5ff   :  { %v807_v29 = vpop.f32.mrf.mxu2 }
 0x600   :  { %811 = vst [vmem:[#allocation11] sm:$0xff] %v807_v29 }
 0x601   :  { %822 = dma.vmem_to_hbm [thread:$0]  %s818_s4, 128, %s820_s19, [#allocation4]  }
 0x607   :  { %v809_v30 = vpop.f32.mrf.mxu2 }
 0x608   :  { %1208 = dma.done.wait [#allocation4], 128  }
 0x609   :  { %1209 = vsyncadd [#allocation4], 4294967168 }
 0x60a   :  { %827 = vsyncpa [#allocation3], 1 }
 0x60b   :  { %828 = vsyncpa [#allocation6], 1 }
 0x60c   :  { %829 = vsyncpa [#allocation9], 1 }
 0x60d   :  { %830 = vsyncpa [#allocation4], 1 }

</bundles_post_ra>
